<compile_context>
chip_gen: v7x
topology: tpu7x:2x2x1
jax: 0.10.0
libtpu: 0.0.40
codegen_flags: <defaults>
</compile_context>

<pallas_src>
import functools

import jax
import jax.numpy as jnp
from jax.experimental import pallas as pl
from jax.experimental.pallas import tpu as pltpu


def _round_up(x, m):
    return (x + m - 1) // m * m


def _pick_t_tile(T, bytes_per_col, target_bytes=8 << 20, cap=4096):
    """128-aligned T tile of ~target_bytes of x; prefer a divisor of T (no padding)."""
    full = _round_up(T, 128)
    max_cols = (target_bytes // max(bytes_per_col, 1)) // 128 * 128
    max_cols = int(min(max(max_cols, 128), cap))
    if full <= max_cols:
        return full                       # single tile covers all of T
    for cand in range(max_cols, 127, -128):
        if T % cand == 0:
            return cand                   # divides T exactly: no T padding needed
    return max_cols                       # tail tile is zero-padded by the wrapper


def _asp_kernel(T, t_tile, mxu_dtype, x_ref, W_ref, b_ref, vT_ref, k_ref, o_ref,
                s_acc, q_acc, z_acc):
    t_idx = pl.program_id(1)
    n_t = pl.num_programs(1)
    n_grp = t_tile // 128

    @pl.when(t_idx == 0)
    def _():
        s_acc[...] = jnp.zeros_like(s_acc)
        q_acc[...] = jnp.zeros_like(q_acc)
        z_acc[...] = jnp.zeros_like(z_acc)

    x = x_ref[0]                            # (C_pad, t_tile), native dtype, zero-padded
    Wm = W_ref[...]                         # (H, C_pad), native dtype
    b = b_ref[...].astype(jnp.float32)      # (H, 1)
    vT = vT_ref[...].astype(jnp.float32)    # (1, H)
    k = k_ref[0, 0]                         # scalar attention bias (SMEM, f32)

    # ---- attention scores for this T tile (MXU, native operands, f32 accumulate) ----
    x_mm = x if mxu_dtype is None else x.astype(mxu_dtype)
    h = jnp.dot(Wm, x_mm, preferred_element_type=jnp.float32) + b       # (H, t_tile)
    h = jnp.maximum(h, 0.0)
    e = jnp.dot(vT, h, preferred_element_type=jnp.float32) + k          # (1, t_tile)
    aw = jnp.exp(jnp.tanh(e))               # unnormalized softmax weights, f32

    if T % t_tile != 0:
        # Cheap (1, t_tile) mask: zero the weights of the zero-padded tail columns.
        # x itself is exactly 0 there, so the S/Q accumulation needs no extra mask.
        col = jax.lax.broadcasted_iota(jnp.int32, (1, t_tile), 1)
        aw = jnp.where(t_idx * t_tile + col < T, aw, 0.0)

    # ---- one-pass weighted statistics, pure VPU (no N=1 MXU matmuls) ----
    # Fold the n_grp lane groups with lane-aligned slices + vreg adds into
    # (C_pad, 128) f32 accumulators; cross-lane reduction only at finalize.
    for g in range(n_grp):
        sl = slice(g * 128, (g + 1) * 128)
        xg = x[:, sl].astype(jnp.float32)   # (C_pad, 128)
        wg = aw[:, sl]                      # (1, 128), broadcast over sublanes
        xw = xg * wg
        s_acc[...] += xw
        q_acc[...] += xg * xw               # reuse xw for the E[x^2] term
        z_acc[...] += wg

    # ---- finalize: normalize, variance, lane-dense store ----
    @pl.when(t_idx == n_t - 1)
    def _():
        z = jnp.sum(z_acc[...])
        inv_z = 1.0 / z
        mean = jnp.sum(s_acc[...], axis=-1, keepdims=True) * inv_z      # (C_pad, 1)
        ex2 = jnp.sum(q_acc[...], axis=-1, keepdims=True) * inv_z
        # E[x^2] - mean^2, clamped at 0 (module has no eps inside sqrt);
        # f32 accumulation precision throughout.
        var = jnp.maximum(ex2 - mean * mean, 0.0)
        std = jnp.sqrt(var)
        out = jnp.concatenate([mean.T, std.T], axis=0)                   # (2, C_pad)
        o_ref[0] = out.astype(o_ref.dtype)


def attentive_stat_pooling(x, W, b, v, k, *, t_tile=None, mxu_dtype=None,
                           target_tile_bytes=8 << 20, interpret=False):
    """x: (B, C, T); W: (H, C); b: (H, 1); v: (H, 1); k: (1, 1)  ->  (B, 2C)."""
    B, C, T = x.shape
    H = W.shape[0]
    itemsize = jnp.dtype(x.dtype).itemsize

    # Lane-dense output + aligned sublane dim: pad C up to a multiple of 128.
    C_pad = _round_up(C, 128)
    if t_tile is None:
        t_tile = _pick_t_tile(T, C_pad * itemsize, target_tile_bytes)
    assert t_tile % 128 == 0
    T_pad = _round_up(T, t_tile)
    n_t = T_pad // t_tile

    # Zero-pad once in the wrapper so the kernel never sees out-of-bounds garbage
    # in x (steady-state tiles carry no x mask).
    if C_pad != C or T_pad != T:
        x = jnp.pad(x, ((0, 0), (0, C_pad - C), (0, T_pad - T)))
    if C_pad != C:
        W = jnp.pad(W, ((0, 0), (0, C_pad - C)))
    if mxu_dtype is not None:
        W = W.astype(mxu_dtype)             # cast the small weight once, outside
    vT = v.reshape(1, H)
    k = jnp.asarray(k, jnp.float32).reshape(1, 1)    # scalar bias lives in SMEM

    # VMEM budget: double-buffered x tile + params + output + f32 accumulators.
    x_tile_bytes = C_pad * t_tile * itemsize
    needed = (2 * x_tile_bytes
              + 2 * (H * C_pad + 2 * H) * itemsize
              + 2 * 2 * C_pad * itemsize
              + (2 * C_pad + 8) * 128 * 4)
    vmem_limit = int(min(max(needed + (8 << 20), 32 << 20), 48 << 20))

    cost = pl.CostEstimate(
        flops=2 * B * T_pad * H * (C_pad + 1) + 5 * B * T_pad * C_pad,
        transcendentals=2 * B * T_pad,
        bytes_accessed=int(x.size * itemsize + W.size * W.dtype.itemsize
                           + B * 2 * C_pad * itemsize),
    )

    out = pl.pallas_call(
        functools.partial(_asp_kernel, T, t_tile, mxu_dtype),
        out_shape=jax.ShapeDtypeStruct((B, 2, C_pad), x.dtype),
        grid=(B, n_t),
        in_specs=[
            pl.BlockSpec((1, C_pad, t_tile), lambda bi, ti: (bi, 0, ti)),
            pl.BlockSpec((H, C_pad), lambda bi, ti: (0, 0)),
            pl.BlockSpec((H, 1), lambda bi, ti: (0, 0)),
            pl.BlockSpec((1, H), lambda bi, ti: (0, 0)),
            pl.BlockSpec(memory_space=pltpu.MemorySpace.SMEM),
        ],
        out_specs=pl.BlockSpec((1, 2, C_pad), lambda bi, ti: (bi, 0, 0)),
        scratch_shapes=[
            pltpu.VMEM((C_pad, 128), jnp.float32),   # sum_t w * x   (per lane group)
            pltpu.VMEM((C_pad, 128), jnp.float32),   # sum_t w * x^2
            pltpu.VMEM((1, 128), jnp.float32),       # sum_t w
        ],
        compiler_params=pltpu.CompilerParams(
            dimension_semantics=("parallel", "arbitrary"),
            vmem_limit_bytes=vmem_limit),
        cost_estimate=cost,
        interpret=interpret,
    )(x, W, b, vT, k)

    # cat([mean, std], dim=1) == slice + contiguous reshape of the lane-dense slab.
    return out[:, :, :C].reshape(B, 2 * C)


def _reference(x, W, b, v, k):
    """Plain-JAX transcription of the PyTorch forward."""
    h = jnp.maximum(jnp.einsum("hc,bct->bht", W, x) + b[None], 0.0)
    e = jnp.einsum("h,bht->bt", v[:, 0], h) + k[0, 0]
    alpha = jax.nn.softmax(jnp.tanh(e), axis=1)                       # (B, T)
    mean = jnp.einsum("bct,bt->bc", x, alpha)                         # (B, C)
    var = jnp.einsum("bct,bt->bc", (x - mean[:, :, None]) ** 2, alpha)
    std = jnp.sqrt(var)
    return jnp.concatenate([mean, std], axis=1)                       # (B, 2C)


if __name__ == "__main__":
    key = jax.random.PRNGKey(0)
    k0, k1, k2, k3, k4 = jax.random.split(key, 5)

    B, C, T, H = 2, 4, 16, 8
    x = jax.random.normal(k0, (B, C, T), dtype=jnp.float32)
    W = jax.random.normal(k1, (H, C), dtype=jnp.float32) * (2.0 / C) ** 0.5
    b_p = jax.random.normal(k2, (H, 1), dtype=jnp.float32) * 0.1
    v_p = jax.random.normal(k3, (H, 1), dtype=jnp.float32) * (2.0 / H) ** 0.5
    k_p = jax.random.normal(k4, (1, 1), dtype=jnp.float32) * 0.1

    # Single-tile path (T < 128 -> one padded+masked tile).
    out = attentive_stat_pooling(x, W, b_p, v_p, k_p)
    out = jax.block_until_ready(out)
    ref = _reference(x, W, b_p, v_p, k_p)
    assert out.shape == (B, 2 * C)
    assert jnp.allclose(out, ref, atol=1e-4, rtol=1e-4), (
        f"max abs err = {jnp.max(jnp.abs(out - ref))}")

    # Multi-tile path: force t_tile=128 so T=300 spans 3 tiles incl. a padded tail.
    T2 = 300
    x2 = jax.random.normal(k0, (B, C, T2), dtype=jnp.float32)
    out2 = jax.block_until_ready(
        attentive_stat_pooling(x2, W, b_p, v_p, k_p, t_tile=128))
    ref2 = _reference(x2, W, b_p, v_p, k_p)
    assert jnp.allclose(out2, ref2, atol=1e-4, rtol=1e-4), (
        f"max abs err = {jnp.max(jnp.abs(out2 - ref2))}")

    print("KERNEL_OK")
</pallas_src>

<mosaic_0001>
module attributes {stable_mosaic.version = 11 : i64} {
  func.func @_asp_kernel(%arg0: i32, %arg1: i32, %arg2: memref<1x128x128xf32, #tpu.memory_space<vmem>>, %arg3: memref<8x128xf32, #tpu.memory_space<vmem>>, %arg4: memref<8x1xf32, #tpu.memory_space<vmem>>, %arg5: memref<1x8xf32, #tpu.memory_space<vmem>>, %arg6: memref<1x1xf32, #tpu.memory_space<smem>>, %arg7: memref<1x2x128xf32, #tpu.memory_space<vmem>>, %arg8: memref<128x128xf32, #tpu.memory_space<vmem>>, %arg9: memref<128x128xf32, #tpu.memory_space<vmem>>, %arg10: memref<1x128xf32, #tpu.memory_space<vmem>>) attributes {dimension_semantics = [#tpu.dimension_semantics<parallel>, #tpu.dimension_semantics<arbitrary>], iteration_bounds = array<i64: 2, 1>, scalar_prefetch = 0 : i64, scratch_operands = 3 : i64, tpu.core_type = #tpu.core_type<tc>, window_params = [{transform_indices = @transform_0, window_bounds = array<i64: 1, 128, 128>}, {pipeline_mode = #tpu.pipeline_mode<synchronous>, transform_indices = @transform_1, window_bounds = array<i64: 8, 128>}, {pipeline_mode = #tpu.pipeline_mode<synchronous>, transform_indices = @transform_2, window_bounds = array<i64: 8, 1>}, {pipeline_mode = #tpu.pipeline_mode<synchronous>, transform_indices = @transform_3, window_bounds = array<i64: 1, 8>}, {transform_indices = @transform_4, window_bounds = array<i64: 1, 1>}, {transform_indices = @transform_5, window_bounds = array<i64: 1, 2, 128>}]} {
    %c0_i32 = arith.constant 0 : i32
    %0 = arith.cmpi eq, %arg1, %c0_i32 : i32
    %1 = arith.extui %0 : i1 to i32
    %c0_i32_0 = arith.constant 0 : i32
    %2 = arith.cmpi ne, %1, %c0_i32_0 : i32
    scf.if %2 {
      %cst_28 = arith.constant 0.000000e+00 : f32
      %42 = vector.broadcast %cst_28 : f32 to vector<128x128xf32>
      %c0_29 = arith.constant 0 : index
      %c0_30 = arith.constant 0 : index
      %43 = vector.load %arg8[%c0_29, %c0_30] : memref<128x128xf32, #tpu.memory_space<vmem>>, vector<128x128xf32>
      tpu.vector_store %arg8[%c0_29, %c0_30], %42 {strides = array<i32>} : memref<128x128xf32, #tpu.memory_space<vmem>>, vector<128x128xf32>,
      %cst_31 = arith.constant 0.000000e+00 : f32
      %44 = vector.broadcast %cst_31 : f32 to vector<128x128xf32>
      %c0_32 = arith.constant 0 : index
      %c0_33 = arith.constant 0 : index
      %45 = vector.load %arg9[%c0_32, %c0_33] : memref<128x128xf32, #tpu.memory_space<vmem>>, vector<128x128xf32>
      tpu.vector_store %arg9[%c0_32, %c0_33], %44 {strides = array<i32>} : memref<128x128xf32, #tpu.memory_space<vmem>>, vector<128x128xf32>,
      %cst_34 = arith.constant 0.000000e+00 : f32
      %46 = vector.broadcast %cst_34 : f32 to vector<1x128xf32>
      %c0_35 = arith.constant 0 : index
      %c0_36 = arith.constant 0 : index
      %47 = vector.load %arg10[%c0_35, %c0_36] : memref<1x128xf32, #tpu.memory_space<vmem>>, vector<1x128xf32>
      tpu.vector_store %arg10[%c0_35, %c0_36], %46 {strides = array<i32>} : memref<1x128xf32, #tpu.memory_space<vmem>>, vector<1x128xf32>,
    } else {
    }
    %c0 = arith.constant 0 : index
    %c0_1 = arith.constant 0 : index
    %c0_2 = arith.constant 0 : index
    %3 = vector.load %arg2[%c0, %c0_1, %c0_2] : memref<1x128x128xf32, #tpu.memory_space<vmem>>, vector<1x128x128xf32>
    %4 = vector.shape_cast %3 : vector<1x128x128xf32> to vector<128x128xf32>
    %c0_3 = arith.constant 0 : index
    %c0_4 = arith.constant 0 : index
    %5 = vector.load %arg3[%c0_3, %c0_4] : memref<8x128xf32, #tpu.memory_space<vmem>>, vector<8x128xf32>
    %c0_5 = arith.constant 0 : index
    %c0_6 = arith.constant 0 : index
    %6 = vector.load %arg4[%c0_5, %c0_6] : memref<8x1xf32, #tpu.memory_space<vmem>>, vector<8x1xf32>
    %c0_7 = arith.constant 0 : index
    %c0_8 = arith.constant 0 : index
    %7 = vector.load %arg5[%c0_7, %c0_8] : memref<1x8xf32, #tpu.memory_space<vmem>>, vector<1x8xf32>
    %c0_9 = arith.constant 0 : index
    %c0_10 = arith.constant 0 : index
    %8 = memref.load %arg6[%c0_9, %c0_10] : memref<1x1xf32, #tpu.memory_space<smem>>
    %cst = arith.constant dense<0.000000e+00> : vector<8x128xf32>
    %9 = tpu.matmul %5, %4, %cst {dimension_numbers = #tpu.dot_dimension_numbers<[1], [0], [0], [1], [0, 0, 1, 1], [], []>} : vector<8x128xf32>, vector<128x128xf32>, vector<8x128xf32> -> vector<8x128xf32>
    %10 = vector.broadcast %6 : vector<8x1xf32> to vector<8x128xf32>
    %11 = arith.addf %9, %10 : vector<8x128xf32>
    %cst_11 = arith.constant 0.000000e+00 : f32
    %12 = vector.broadcast %cst_11 : f32 to vector<8x128xf32>
    %13 = arith.maximumf %11, %12 : vector<8x128xf32>
    %cst_12 = arith.constant dense<0.000000e+00> : vector<1x128xf32>
    %14 = tpu.matmul %7, %13, %cst_12 {dimension_numbers = #tpu.dot_dimension_numbers<[1], [0], [0], [1], [0, 0, 1, 1], [], []>} : vector<1x8xf32>, vector<8x128xf32>, vector<1x128xf32> -> vector<1x128xf32>
    %15 = vector.broadcast %8 : f32 to vector<1x128xf32>
    %16 = arith.addf %14, %15 : vector<1x128xf32>
    %17 = math.tanh %16 : vector<1x128xf32>
    %18 = math.exp %17 : vector<1x128xf32>
    %19 = tpu.iota {dimensions = array<i32: 1>} : vector<1x128xi32>
    %c128_i32 = arith.constant 128 : i32
    %20 = arith.muli %arg1, %c128_i32 : i32
    %21 = vector.broadcast %20 : i32 to vector<1x128xi32>
    %22 = arith.addi %21, %19 : vector<1x128xi32>
    %c16_i32 = arith.constant 16 : i32
    %23 = vector.broadcast %c16_i32 : i32 to vector<1x128xi32>
    %24 = arith.cmpi slt, %22, %23 : vector<1x128xi32>
    %cst_13 = arith.constant 0.000000e+00 : f32
    %25 = vector.broadcast %cst_13 : f32 to vector<1x128xf32>
    %26 = arith.select %24, %18, %25 : vector<1x128xi1>, vector<1x128xf32>
    %27 = vector.broadcast %26 : vector<1x128xf32> to vector<128x128xf32>
    %28 = arith.mulf %4, %27 : vector<128x128xf32>
    %c0_14 = arith.constant 0 : index
    %c0_15 = arith.constant 0 : index
    %29 = vector.load %arg8[%c0_14, %c0_15] : memref<128x128xf32, #tpu.memory_space<vmem>>, vector<128x128xf32>
    %30 = arith.addf %29, %28 : vector<128x128xf32>
    %c0_16 = arith.constant 0 : index
    %c0_17 = arith.constant 0 : index
    %31 = vector.load %arg8[%c0_16, %c0_17] : memref<128x128xf32, #tpu.memory_space<vmem>>, vector<128x128xf32>
    tpu.vector_store %arg8[%c0_16, %c0_17], %30 {strides = array<i32>} : memref<128x128xf32, #tpu.memory_space<vmem>>, vector<128x128xf32>,
    %c0_18 = arith.constant 0 : index
    %c0_19 = arith.constant 0 : index
    %32 = vector.load %arg9[%c0_18, %c0_19] : memref<128x128xf32, #tpu.memory_space<vmem>>, vector<128x128xf32>
    %33 = arith.mulf %4, %28 : vector<128x128xf32>
    %34 = arith.addf %32, %33 : vector<128x128xf32>
    %c0_20 = arith.constant 0 : index
    %c0_21 = arith.constant 0 : index
    %35 = vector.load %arg9[%c0_20, %c0_21] : memref<128x128xf32, #tpu.memory_space<vmem>>, vector<128x128xf32>
    tpu.vector_store %arg9[%c0_20, %c0_21], %34 {strides = array<i32>} : memref<128x128xf32, #tpu.memory_space<vmem>>, vector<128x128xf32>,
    %c0_22 = arith.constant 0 : index
    %c0_23 = arith.constant 0 : index
    %36 = vector.load %arg10[%c0_22, %c0_23] : memref<1x128xf32, #tpu.memory_space<vmem>>, vector<1x128xf32>
    %37 = arith.addf %36, %26 : vector<1x128xf32>
    %c0_24 = arith.constant 0 : index
    %c0_25 = arith.constant 0 : index
    %38 = vector.load %arg10[%c0_24, %c0_25] : memref<1x128xf32, #tpu.memory_space<vmem>>, vector<1x128xf32>
    tpu.vector_store %arg10[%c0_24, %c0_25], %37 {strides = array<i32>} : memref<1x128xf32, #tpu.memory_space<vmem>>, vector<1x128xf32>,
    %c0_i32_26 = arith.constant 0 : i32
    %39 = arith.cmpi eq, %arg1, %c0_i32_26 : i32
    %40 = arith.extui %39 : i1 to i32
    %c0_i32_27 = arith.constant 0 : i32
    %41 = arith.cmpi ne, %40, %c0_i32_27 : i32
    scf.if %41 {
      %c0_28 = arith.constant 0 : index
      %c0_29 = arith.constant 0 : index
      %42 = vector.load %arg10[%c0_28, %c0_29] : memref<1x128xf32, #tpu.memory_space<vmem>>, vector<1x128xf32>
      %43 = vector.shape_cast %42 : vector<1x128xf32> to vector<1x1x128xf32>
      %cst_30 = arith.constant dense<0.000000e+00> : vector<1xf32>
      %44 = vector.multi_reduction <add>, %43, %cst_30 [1, 2] : vector<1x1x128xf32> to vector<1xf32>
      %45 = vector.shape_cast %44 : vector<1xf32> to vector<1x1x1xf32>
      %46 = vector.extract %45[0, 0, 0] : f32 from vector<1x1x1xf32>
      %cst_31 = arith.constant 1.000000e+00 : f32
      %47 = arith.divf %cst_31, %46 : f32
      %c0_32 = arith.constant 0 : index
      %c0_33 = arith.constant 0 : index
      %48 = vector.load %arg8[%c0_32, %c0_33] : memref<128x128xf32, #tpu.memory_space<vmem>>, vector<128x128xf32>
      %cst_34 = arith.constant dense<0.000000e+00> : vector<128xf32>
      %49 = vector.multi_reduction <add>, %48, %cst_34 [1] : vector<128x128xf32> to vector<128xf32>
      %50 = vector.shape_cast %49 : vector<128xf32> to vector<128x1xf32>
      %51 = vector.broadcast %47 : f32 to vector<128x1xf32>
      %52 = arith.mulf %50, %51 : vector<128x1xf32>
      %c0_35 = arith.constant 0 : index
      %c0_36 = arith.constant 0 : index
      %53 = vector.load %arg9[%c0_35, %c0_36] : memref<128x128xf32, #tpu.memory_space<vmem>>, vector<128x128xf32>
      %cst_37 = arith.constant dense<0.000000e+00> : vector<128xf32>
      %54 = vector.multi_reduction <add>, %53, %cst_37 [1] : vector<128x128xf32> to vector<128xf32>
      %55 = vector.shape_cast %54 : vector<128xf32> to vector<128x1xf32>
      %56 = vector.broadcast %47 : f32 to vector<128x1xf32>
      %57 = arith.mulf %55, %56 : vector<128x1xf32>
      %58 = arith.mulf %52, %52 : vector<128x1xf32>
      %59 = arith.subf %57, %58 : vector<128x1xf32>
      %cst_38 = arith.constant 0.000000e+00 : f32
      %60 = vector.broadcast %cst_38 : f32 to vector<128x1xf32>
      %61 = arith.maximumf %59, %60 : vector<128x1xf32>
      %62 = math.sqrt %61 : vector<128x1xf32>
      %63 = tpu.transpose %52, [1, 0] : vector<128x1xf32> -> vector<1x128xf32>
      %64 = tpu.transpose %62, [1, 0] : vector<128x1xf32> -> vector<1x128xf32>
      %65 = tpu.concatenate %63, %64 in 0 : vector<1x128xf32>, vector<1x128xf32> -> vector<2x128xf32>
      %c0_39 = arith.constant 0 : index
      %c0_40 = arith.constant 0 : index
      %c0_41 = arith.constant 0 : index
      %66 = vector.load %arg7[%c0_39, %c0_40, %c0_41] : memref<1x2x128xf32, #tpu.memory_space<vmem>>, vector<1x2x128xf32>
      %67 = vector.shape_cast %66 : vector<1x2x128xf32> to vector<2x128xf32>
      %68 = vector.shape_cast %65 : vector<2x128xf32> to vector<1x2x128xf32>
      tpu.vector_store %arg7[%c0_39, %c0_40, %c0_41], %68 {strides = array<i32>} : memref<1x2x128xf32, #tpu.memory_space<vmem>>, vector<1x2x128xf32>,
    } else {
    }
    return
  }
  func.func @transform_0(%arg0: i32, %arg1: i32) -> (i32, i32, i32) {
    %c0_i32 = arith.constant 0 : i32
    %c0_i32_0 = arith.constant 0 : i32
    return %arg0, %c0_i32, %arg1 : i32, i32, i32
  }
  func.func @transform_1(%arg0: i32, %arg1: i32) -> (i32, i32) {
    %c0_i32 = arith.constant 0 : i32
    %c0_i32_0 = arith.constant 0 : i32
    %c0_i32_1 = arith.constant 0 : i32
    return %c0_i32, %c0_i32_0 : i32, i32
  }
  func.func @transform_2(%arg0: i32, %arg1: i32) -> (i32, i32) {
    %c0_i32 = arith.constant 0 : i32
    %c0_i32_0 = arith.constant 0 : i32
    %c0_i32_1 = arith.constant 0 : i32
    return %c0_i32, %c0_i32_0 : i32, i32
  }
  func.func @transform_3(%arg0: i32, %arg1: i32) -> (i32, i32) {
    %c0_i32 = arith.constant 0 : i32
    %c0_i32_0 = arith.constant 0 : i32
    %c0_i32_1 = arith.constant 0 : i32
    return %c0_i32, %c0_i32_0 : i32, i32
  }
  func.func @transform_4(%arg0: i32, %arg1: i32) -> (i32, i32) {
    %c0_i32 = arith.constant 0 : i32
    %c0_i32_0 = arith.constant 0 : i32
    %c0_i32_1 = arith.constant 0 : i32
    return %c0_i32, %c0_i32_0 : i32, i32
  }
  func.func @transform_5(%arg0: i32, %arg1: i32) -> (i32, i32, i32) {
    %c0_i32 = arith.constant 0 : i32
    %c0_i32_0 = arith.constant 0 : i32
    %c0_i32_1 = arith.constant 0 : i32
    return %arg0, %c0_i32, %c0_i32_0 : i32, i32, i32
  }
}

</mosaic_0001>

<bundles_post_ra>
// kernel: tpu_custom_call.1
= control target key start
LH: loop header
LB: loop body
LE: loop exit
PB: predicated region body
PF: predicated region fallthrough
CT: control target
= control target key end

     0   :  { %s1870_s0 = inlined_call_operand.hbm [shape: f32[2,128,128], index: 0, kind: input, shape index: {}]   ;;  %s1871_s1 = inlined_call_operand.vmem [shape: f32[8,128], index: 1, kind: input, shape index: {}]   ;;  %s1872_s2 = inlined_call_operand.vmem [shape: f32[8,1], index: 2, kind: input, shape index: {}]   ;;  %s1873_s3 = inlined_call_operand.vmem [shape: f32[1,8], index: 3, kind: input, shape index: {}]   ;;  %s1874_s4 = inlined_call_operand.<no memory space> [shape: f32[1,1], index: 4, kind: input, shape index: {}]   ;;  %s1875_s5 = inlined_call_operand.hbm [shape: f32[2,2,128], index: 5, kind: output, shape index: {}]  }
   0x1   :  { %10 = sst [smem:[#allocation5]] %s1874_s4 }
   0x2   :  { %11 = vsyncpa [#allocation7], 0 }
   0x3   :  { %13 = vsyncpa [#allocation7 + $0x1], 0 }
   0x4   :  { %14 = vsyncpa [#allocation8], 0 }
   0x5   :  { %16 = vsyncpa [#allocation8 + $0x1], 0  ;;  %s1447_s20 = smov 0   ;;  %s1449_s21 = smov 0  }
   0x6   :  { %s1451_s22 = smov 0   ;;  %s1453_s23 = smov 0  }
   0x7   :  { %s1455_s24 = smov 0   ;;  %s1457_s25 = smov 0  }
   0x8 LB: > { %s1082_s4 = sadd.s32 4294967295, %s1404_s25   ;;  %s1083_s26 = sadd.s32 4294967294, %s1404_s25   ;;  %s1404_s25 = sphi %s1457_s25, %s22_s25   ;;  %s1400_s24 = sphi %s1455_s24, %s1890_s24   ;;  %s1396_s23 = sphi %s1453_s23, %s1889_s23   ;;  %s1392_s22 = sphi %s1451_s22, %s1888_s22   ;;  %s1388_s21 = sphi %s1449_s21, %s1887_s21   ;;  %s1384_s20 = sphi %s1447_s20, %s1886_s20  }
   0x9   : > { %s34_s27 = sadd.s32 1, %s1400_s24  ;;  %s43_s28 = sadd.s32 1, %s1392_s22 }
   0xa   : > { %p36_p0 = scmp.ge.s32.totalorder %s34_s27, 2  ;;  %p50_p1 = scmp.ne.s32.totalorder %s1392_s22, %s1388_s21 }
   0xb   : > { %p51_p2 = scmp.eq.s32.totalorder %s1404_s25, 0  ;;  %p56_p3 = scmp.ne.s32.totalorder %s1388_s21, %s1384_s20 }
   0xc   : > { %s1892_s27 = smov (%p36_p0, %s34_s27), 0  ;;  %p57_p5 = scmp.eq.s32.totalorder %s1082_s4, 0 }
   0xd   : > { %p1488_p4 = por %p51_p2, %p50_p1  ;;  %s38_s30 = ssub.s32 %s1400_s24, %s1892_s27 }
   0xe   : > { %p164_p6 = scmp.eq.s32.totalorder %s1082_s4, 1  ;;  %p41_p7 = scmp.eq.s32.totalorder %s38_s30, 0 }
   0xf   : > { %p1494_p8 = por %p57_p5, %p56_p3  ;;  %p170_p10 = scmp.eq.s32.totalorder %s1083_s26, 1 }
  0x10   : > { %p1498_p9 = por %p164_p6, %p50_p1  ;;  %p1197_p13 = scmp.lt.s32.totalorder %s1404_s25, 2 }
  0x11   : > { %s1503_s8 = scalar_select %p41_p7, %s1392_s22, %s43_s28  }
  0x12   : > { %s1879_s7 = scalar_select %p1498_p9, 1, 0 }
  0x13   : > { %p1505_p11 = por %p170_p10, %p56_p3  ;;  %s202_s10 = sand.u32 1, %s1392_s22  }
  0x14   : > { %s1086_s11 = sshll.u32 %s202_s10, 7  ;;  %s1097_s12 = sshll.u32 %s1400_s24, 11 }
  0x15   : > { %s1880_s9 = scalar_select %p1505_p11, 1, 0 }
  0x16   : > { %s1516_s15 = scalar_lea.hbm %s1870_s0, %s1097_s12  ;;  %s206_s16 = scalar_lea.vmem [#allocation6], %s1086_s11 }
  0x17   : > { %s214_s17 = sshll.u32 %s206_s16, 4  ;;  %p1522_p0 = pnand %p1197_p13, %p1488_p4  ;;  %s1518_s17 = int_to_ptr.vmem [resolvable:$true] %s214_s17 }
  0x18   : > { %s1527_s19 = scalar_lea.sflag [#allocation7], %s202_s10  ;;  %s1292_s4 = scalar_lea.hbm %s1516_s15, 2048 }
  0x19   : > { %p1293_p2 = scmp.ne.s32.totalorder %s1516_s15, %s1292_s4  ;;  %p1294_p3 = pneg %p1522_p0 }
  0x1a   : > { %s1297_s29 = scalar_lea.hbm %s1870_s0, 4096  ;;  %p1298_p4 = scmp.lt.u32.totalorder %s1516_s15, %s1870_s0 }
  0x1b   : > { %p1295_p5 = pnand %p1294_p3, %p1293_p2  ;;  %p1299_p7 = scmp.lt.u32.totalorder %s1297_s29, %s1292_s4 }
  0x1c   : > { %p1301_p13 = scmp.lt.u32.totalorder %s1292_s4, %s1516_s15 }
  0x1d   : > { %p1296_p6 = pneg %p1295_p5  ;;  %p1300_p10 = por %p1299_p7, %p1298_p4 }
  0x1f   : > { %p1302_p12 = por %p1301_p13, %p1300_p10 }
  0x21   : > { %p1303_p1 = pnand %p1302_p12, %p1296_p6 }
  0x23   : > { %1306 = shalt.err (!%p1303_p1)
}
  0x24   : > { %s1307_s10 = scalar_lea.vmem %s1518_s17, 2048  ;;  %s1406_s12 = smov [#allocation6]  }
  0x25   : > { %p1308_p2 = scmp.ne.s32.totalorder %s1518_s17, %s1307_s10  ;;  %s1312_s13 = sshll.u32 %s1406_s12, 4  ;;  %s1313_s13 = int_to_ptr.vmem [resolvable:$false] %s1312_s13 }
  0x26   : > { %s1314_s14 = scalar_lea.vmem %s1313_s13, 4096  ;;  %p1315_p9 = scmp.lt.s32.totalorder %s1518_s17, %s1313_s13 }
  0x27   : > { %p1310_p5 = pnand %p1308_p2, %p1294_p3  ;;  %p1316_p4 = scmp.lt.s32.totalorder %s1314_s14, %s1307_s10 }
  0x29   : > { %p1311_p11 = pneg %p1310_p5  ;;  %p1317_p7 = por %p1316_p4, %p1315_p9 }
  0x2b   : > { %p1318_p10 = pnand %p1317_p7, %p1311_p11 }
  0x2d   : > { %1321 = shalt.err (!%p1318_p10)
}
  0x2e   : > { %s1407_s16 = smov 128   ;;  %s1408_s4 = smov 8  }
  0x2f   : > { %1192 = dma.hbm_to_vmem [thread:$0]  (!%p1522_p0), %s1516_s15, 2048, %s1518_s17, %s1527_s19, %s1407_s16, %s1407_s16, %s1408_s4  }
  0x30   : > { %p222_p12 = scmp.lt.s32.totalorder %s1404_s25, 3  ;;  %p1882_p1 = scmp.ge.s32.totalorder %s1404_s25, 1 }
  0x32   : > { %p223_p3 = pnand %p1882_p1, %p222_p12 }
  0x33   : > { %s1559_s26 = sand.u32 (!%p223_p3), 1, %s1388_s21  }
  0x34   : > { %226 = sbr.rel (%p223_p3) target bundleno = 1004 (0x3ec), region = 40  ;;  %s1090_s28 = sshll.u32 (!%p223_p3), %s1559_s26, 7 }
  0x35   : > { %s229_s29 = scalar_lea.sflag (!%p223_p3), [#allocation7], %s1559_s26  ;;  %s1563_s30 = scalar_lea.vmem (!%p223_p3), [#allocation6], %s1090_s28 }
  0x3b   : > { %1375 = dma.done.wait (%p1494_p8), %s229_s29, 2048  }
  0x3c   : > { %1377 = vsyncadd (%p1494_p8), %s229_s29, 4294965248  ;;  %v1409_v0 = vmov 0.0|0.0   ;;  %v1410_v1 = vmov 0.0   ;;  %vm1411_vm0 = vmmov 0   ;;  %v1412_v2 = vmov 0   ;;  %v1570_v3 = vld [vmem:[%s1563_s30] sm:$0xff] }
  0x3d   : > { %1157 = vmatprep.subr.bf16.mxu0 %v1409_v0  ;;  %295 = vst [vmem:[#allocation4] sm:$0x1] %v1410_v1  ;;  %1149 = vmatprep.mubr.msk.f32.mxu0 %vm1411_vm0, %v1410_v1  ;;  %v1573_v4 = vld [vmem:[%s1563_s30 + $0x8] sm:$0xff]  ;;  %v1576_v5 = vld [vmem:[%s1563_s30 + $0x10] sm:$0xff]  ;;  %v1581_v7 = vld [vmem:[%s1563_s30 + $0x18] sm:$0xff]  ;;  %vm393_vm1 = vcmask 64512   ;;  %v470_v41 = vlaneseq }
  0x3e   : > { %1253 = vset.pattern.permute.xlu0 %v1412_v2  ;;  %1152 = vmatprep.subr.mxu1 %v1410_v1  ;;  %v1158_v6 = vpack.c.bf16 %v1573_v4, %v1570_v3  ;;  %v1161_v8 = vpack.c.bf16 %v1581_v7, %v1576_v5  ;;  %v1586_v9 = vld [vmem:[%s1563_s30 + $0x20] sm:$0xff]  ;;  %v1589_v10 = vld [vmem:[%s1563_s30 + $0x28] sm:$0xff]  ;;  %v1597_v13 = vld [vmem:[%s1563_s30 + $0x30] sm:$0xff]  ;;  %s315_s10 = sld [smem:[#allocation5]]  ;;  %vm616_vm3 = vcmask 1040384   ;;  %s1091_s14 = sshll.u32 %s1559_s26, 1 }
  0x3f   : > { %1154 = vmatprep.mubr.msk.f32.mxu1 %vm1411_vm0, %v1410_v1  ;;  %v313_v11 = vld [vmem:[%s1872_s2] sm:$0xff]  ;;  %v1164_v12 = vpack.c.bf16 %v1589_v10, %v1586_v9  ;;  %v1608_v17 = vld [vmem:[%s1563_s30 + $0x48] sm:$0xff]  ;;  %v1613_v19 = vld [vmem:[%s1563_s30 + $0x50] sm:$0xff]  ;;  %v471_v42 = vand.u32 127, %v470_v41  ;;  %v478_v43 = vshrl.u32 %v470_v41, 7  ;;  %s1094_s16 = sshll.u32 %s1396_s23, 5 }
  0x40   : > { %1159 = vmatpush3.bf16.msra.mxu0 %v1158_v6  ;;  %318 = vperm.xlu0 %1253, %v313_v11   ;;  %v1600_v14 = vld [vmem:[%s1563_s30 + $0x38] sm:$0xff]  ;;  %v1605_v16 = vld [vmem:[%s1563_s30 + $0x40] sm:$0xff]  ;;  %v1624_v23 = vld [vmem:[%s1563_s30 + $0x68] sm:$0xff]  ;;  %s258_s4 = scalar_lea.vmem [#allocation9], %s1091_s14  ;;  %s1820_s6 = scalar_lea.hbm %s1875_s5, %s1094_s16 }
  0x41   : > { %1160 = vmatprep.subr.bf16.mxu0 %v1409_v0  ;;  %v1167_v15 = vpack.c.bf16 %v1600_v14, %v1597_v13  ;;  %v1170_v18 = vpack.c.bf16 %v1608_v17, %v1605_v16  ;;  %v1616_v20 = vld [vmem:[%s1563_s30 + $0x58] sm:$0xff]  ;;  %v1621_v22 = vld [vmem:[%s1563_s30 + $0x60] sm:$0xff]  ;;  %v1629_v25 = vld [vmem:[%s1563_s30 + $0x70] sm:$0xff]  ;;  %vm475_vm2 = vcmp.lt.s32.totalorder %v471_v42, 16  ;;  %v479_v44 = vsub.s32 0, %v478_v43  ;;  %s1002_s28 = sshll.u32 %s258_s4, 4  ;;  %s1822_s28 = int_to_ptr.vmem [resolvable:$true] %s1002_s28 }
  0x42   : > { %v1173_v21 = vpack.c.bf16 %v1616_v20, %v1613_v19  ;;  %v1176_v24 = vpack.c.bf16 %v1624_v23, %v1621_v22  ;;  %v1632_v26 = vld [vmem:[%s1563_s30 + $0x78] sm:$0xff]  ;;  %s989_s15 = scalar_lea.sflag [#allocation8], %s1559_s26  ;;  %s1322_s23 = scalar_lea.vmem %s1822_s28, 32 }
  0x43   : > { %v1179_v27 = vpack.c.bf16 %v1632_v26, %v1629_v25  ;;  %v312_v28 = vld [vmem:[%s1871_s1] sm:$0xff]  ;;  %p1323_p8 = scmp.ne.s32.totalorder %s1822_s28, %s1322_s23  ;;  %p1883_p9 = scmp.ne.s32.totalorder %s1879_s7, 0 }
  0x44   : > { %1162 = vmatpush3.bf16.msra.mxu0 %v1161_v8  ;;  %v314_v34 = vld [vmem:[%s1873_s3] sm:$0x1]  ;;  %v392_v35 = vstv %s315_s10  ;;  %s1413_s17 = smov [#allocation9]  }
  0x45   : > { %1163 = vmatprep.subr.bf16.mxu0 %v1409_v0  ;;  %v609_v45 = vld [vmem:[#allocation4] sm:$0x1]  ;;  %p1324_p11 = pnand %p1323_p8, %p1883_p9  ;;  %s1326_s18 = sshll.u32 %s1413_s17, 4  ;;  %s1327_s18 = int_to_ptr.vmem [resolvable:$false] %s1326_s18 }
  0x46   : > { %s1328_s19 = scalar_lea.vmem %s1327_s18, 64  ;;  %p1329_p6 = scmp.lt.s32.totalorder %s1822_s28, %s1327_s18 }
  0x47   : > { %p1325_p0 = pneg %p1324_p11  ;;  %p1330_p13 = scmp.lt.s32.totalorder %s1328_s19, %s1322_s23 }
  0x48   : > { %1165 = vmatpush3.bf16.msra.mxu0 %v1164_v12 }
  0x49   : > { %1166 = vmatprep.subr.bf16.mxu0 %v1409_v0  ;;  %p1331_p2 = por %p1330_p13, %p1329_p6 }
  0x4b   : > { %p1332_p5 = pnand %p1331_p2, %p1325_p0 }
  0x4c   : > { %1168 = vmatpush3.bf16.msra.mxu0 %v1167_v15 }
  0x4d   : > { %1169 = vmatprep.subr.bf16.mxu0 %v1409_v0 }
  0x50   : > { %1171 = vmatpush3.bf16.msra.mxu0 %v1170_v18 }
  0x51   : > { %1172 = vmatprep.subr.bf16.mxu0 %v1409_v0 }
  0x54   : > { %1174 = vmatpush3.bf16.msra.mxu0 %v1173_v21 }
  0x55   : > { %1175 = vmatprep.subr.bf16.mxu0 %v1409_v0 }
  0x58   : > { %1177 = vmatpush3.bf16.msra.mxu0 %v1176_v24 }
  0x59   : > { %1178 = vmatprep.subr.bf16.mxu0 %v1409_v0 }
  0x5c   : > { %1180 = vmatpush3.bf16.msra.mxu0 %v1179_v27 }
  0x5f   : > { %1150 = vmatmul.mubr.f32.vlgmr.msra.gmra.mrb[0].mxu0 %v312_v28 }
  0xbf   : > { %v319_v29 = vpop.permute.xlu0 %318 }
 0x132   : > { %v387_v30 = vpop.f32.mrb[0].mxu0 }
 0x133   : > { %v388_v31 = vadd.f32 %v387_v30, %v319_v29  ;;  %v1151_v32 = vpop.f32.mrb[1].mxu0 }
 0x135   : > { %v391_v33 = vmax.f32 %v388_v31, 0.0 }
 0x137   : > { %1153 = vmatpush3.msra.mxu1 %v391_v33 }
 0x138   : > { %1155 = vmatmul.mubr.msk.f32.vlgmr.msra.gmra.mrb[0].mxu1 %vm393_vm1, %v314_v34 }
 0x20b   : > { %v463_v36 = vpop.f32.mrb[0].mxu1 }
 0x20c   : > { %v464_v37 = vadd.f32 %v463_v36, %v392_v35  ;;  %v1156_v38 = vpop.f32.mrb[1].mxu1 }
 0x20e   : > { %1254 = vtanh.f32 %v464_v37 }
 0x218   : > { %v1255_v39 = vpop.eup %1254 }
 0x219   : > { %v468_v40 = vmul.f32 1.442695, %v1255_v39 }
 0x21b   : > { %1256 = vpow2.f32 %v468_v40 }
 0x225   : > { %v1257_v46 = vpop.eup %1256 }
 0x226   : > { %v476_v47 = vsel %vm475_vm2, %v1257_v46, 0.0 }
 0x227   : > { %v480_v48 = vrot.slane %v476_v47, %v479_v44  ;;  %v610_v49 = vadd.f32 %v609_v45, %v476_v47 }
 0x229   : > { %611 = vst [vmem:[#allocation4] sm:$0x1] %v610_v49  ;;  %v481_v50 = vmul.f32 %v480_v48, %v1570_v3  ;;  %v482_v51 = vmul.f32 %v480_v48, %v1573_v4  ;;  %v486_v55 = vmul.f32 %v480_v48, %v1589_v10  ;;  %v483_v56 = vmul.f32 %v480_v48, %v1576_v5 }
 0x22a   : > { %v487_v57 = vmul.f32 %v480_v48, %v1597_v13  ;;  %v488_v59 = vmul.f32 %v480_v48, %v1600_v14  ;;  %v484_v60 = vmul.f32 %v480_v48, %v1581_v7  ;;  %v489_v61 = vmul.f32 %v480_v48, %v1605_v16 }
 0x22b   : > { %646 = vadd.xlane.f32.xlu1 %v481_v50  ;;  %v561_v54 = vmul.f32 %v481_v50, %v1570_v3  ;;  %v562_v58 = vmul.f32 %v482_v51, %v1573_v4  ;;  %v563_v62 = vmul.f32 %v483_v56, %v1576_v5  ;;  %v490_v63 = vmul.f32 %v480_v48, %v1608_v17 }
 0x22c   : > { %v485_v0 = vmul.f32 %v480_v48, %v1586_v9  ;;  %v491_v1 = vmul.f32 %v480_v48, %v1613_v19  ;;  %v564_v2 = vmul.f32 %v484_v60, %v1581_v7  ;;  %v492_v3 = vmul.f32 %v480_v48, %v1616_v20 }
 0x22d   : > { %v493_v5 = vmul.f32 %v480_v48, %v1621_v22  ;;  %v566_v6 = vmul.f32 %v486_v55, %v1589_v10  ;;  %v494_v8 = vmul.f32 %v480_v48, %v1624_v23  ;;  %v567_v11 = vmul.f32 %v487_v57, %v1597_v13 }
 0x22e   : > { %v565_v4 = vmul.f32 %v485_v0, %v1586_v9  ;;  %v495_v7 = vmul.f32 %v480_v48, %v1629_v25  ;;  %v568_v12 = vmul.f32 %v488_v59, %v1600_v14  ;;  %v496_v9 = vmul.f32 %v480_v48, %v1632_v26 }
 0x22f   : > { %648 = vadd.xlane.f32.xlu1 %v482_v51  ;;  %v569_v15 = vmul.f32 %v489_v61, %v1605_v16  ;;  %v570_v18 = vmul.f32 %v490_v63, %v1608_v17  ;;  %v571_v13 = vmul.f32 %v491_v1, %v1613_v19  ;;  %v572_v21 = vmul.f32 %v492_v3, %v1616_v20 }
 0x230   : > { %v615_v52 = vld [vmem:[#allocation4] sm:$0x1]  ;;  %v576_v10 = vmul.f32 %v496_v9, %v1632_v26  ;;  %v573_v14 = vmul.f32 %v493_v5, %v1621_v22  ;;  %v574_v24 = vmul.f32 %v494_v8, %v1624_v23  ;;  %v575_v16 = vmul.f32 %v495_v7, %v1629_v25 }
 0x231   : > { %v617_v53 = vsel %vm616_vm3, %v615_v52, 0.0 }
 0x232   : > { %618 = vadd.xlane.f32.xlu0 %v617_v53 }
 0x233   : > { %711 = vadd.xlane.f32.xlu1 %v561_v54 }
 0x236   : > { %656 = vadd.xlane.f32.xlu0 %v486_v55 }
 0x237   : > { %650 = vadd.xlane.f32.xlu1 %v483_v56 }
 0x23a   : > { %658 = vadd.xlane.f32.xlu0 %v487_v57 }
 0x23b   : > { %713 = vadd.xlane.f32.xlu1 %v562_v58 }
 0x23e   : > { %660 = vadd.xlane.f32.xlu0 %v488_v59 }
 0x23f   : > { %652 = vadd.xlane.f32.xlu1 %v484_v60 }
 0x242   : > { %662 = vadd.xlane.f32.xlu0 %v489_v61 }
 0x243   : > { %715 = vadd.xlane.f32.xlu1 %v563_v62 }
 0x246   : > { %664 = vadd.xlane.f32.xlu0 %v490_v63 }
 0x247   : > { %654 = vadd.xlane.f32.xlu1 %v485_v0 }
 0x24a   : > { %666 = vadd.xlane.f32.xlu0 %v491_v1 }
 0x24b   : > { %717 = vadd.xlane.f32.xlu1 %v564_v2 }
 0x24e   : > { %668 = vadd.xlane.f32.xlu0 %v492_v3 }
 0x24f   : > { %719 = vadd.xlane.f32.xlu1 %v565_v4 }
 0x252   : > { %670 = vadd.xlane.f32.xlu0 %v493_v5 }
 0x253   : > { %721 = vadd.xlane.f32.xlu1 %v566_v6 }
 0x256   : > { %672 = vadd.xlane.f32.xlu0 %v494_v8 }
 0x257   : > { %723 = vadd.xlane.f32.xlu1 %v567_v11 }
 0x25a   : > { %674 = vadd.xlane.f32.xlu0 %v495_v7 }
 0x25b   : > { %725 = vadd.xlane.f32.xlu1 %v568_v12 }
 0x25e   : > { %676 = vadd.xlane.f32.xlu0 %v496_v9 }
 0x25f   : > { %727 = vadd.xlane.f32.xlu1 %v569_v15 }
 0x262   : > { %741 = vadd.xlane.f32.xlu0 %v576_v10 }
 0x263   : > { %729 = vadd.xlane.f32.xlu1 %v570_v18 }
 0x267   : > { %731 = vadd.xlane.f32.xlu1 %v571_v13 }
 0x26b   : > { %733 = vadd.xlane.f32.xlu1 %v572_v21 }
 0x26f   : > { %735 = vadd.xlane.f32.xlu1 %v573_v14 }
 0x273   : > { %737 = vadd.xlane.f32.xlu1 %v574_v24 }
 0x277   : > { %739 = vadd.xlane.f32.xlu1 %v575_v16 }
 0x2b8   : > { %v647_v22 = vpop.xlane.xlu1 %646 }
 0x2bc   : > { %v649_v32 = vpop.xlane.xlu1 %648 }
 0x2bf   : > { %v619_v26 = vpop.xlane.xlu0 %618 }
 0x2c0   : > { %v620_v27 = vrot.slane %v619_v26, 4  ;;  %v712_v23 = vpop.xlane.xlu1 %711 }
 0x2c2   : > { %v621_v17 = vadd.f32 %v620_v27, %v619_v26 }
 0x2c3   : > { %v657_v36 = vpop.xlane.xlu0 %656 }
 0x2c4   : > { %v622_v28 = vrot.slane %v621_v17, 2  ;;  %v651_v33 = vpop.xlane.xlu1 %650 }
 0x2c6   : > { %v623_v29 = vadd.f32 %v622_v28, %v621_v17 }
 0x2c7   : > { %v659_v41 = vpop.xlane.xlu0 %658 }
 0x2c8   : > { %v624_v30 = vrot.slane %v623_v29, 1  ;;  %v714_v34 = vpop.xlane.xlu1 %713 }
 0x2ca   : > { %v625_v19 = vadd.f32 %v624_v30, %v623_v29 }
 0x2cb   : > { %v661_v44 = vpop.xlane.xlu0 %660 }
 0x2cc   : > { %1181 = vpush %v625_v19  ;;  %v653_v25 = vpop.xlane.xlu1 %652 }
 0x2cf   : > { %v663_v48 = vpop.xlane.xlu0 %662 }
 0x2d0   : > { %v716_v35 = vpop.xlane.xlu1 %715 }
 0x2d3   : > { %v665_v52 = vpop.xlane.xlu0 %664 }
 0x2d4   : > { %v655_v39 = vpop.xlane.xlu1 %654 }
 0x2d7   : > { %v667_v63 = vpop.xlane.xlu0 %666 }
 0x2d8   : > { %v718_v42 = vpop.xlane.xlu1 %717 }
 0x2db   : > { %v669_v12 = vpop.xlane.xlu0 %668 }
 0x2dc   : > { %v720_v46 = vpop.xlane.xlu1 %719 }
 0x2df   : > { %v671_v16 = vpop.xlane.xlu0 %670 }
 0x2e0   : > { %v722_v49 = vpop.xlane.xlu1 %721 }
 0x2e4   : > { %v724_v56 = vpop.xlane.xlu1 %723 }
 0x2e8   : > { %v726_v3 = vpop.xlane.xlu1 %725 }
 0x2ec   : > { %v728_v10 = vpop.xlane.xlu1 %727 }
 0x2f0   : > { %v730_v29 = vpop.xlane.xlu1 %729 }
 0x2fd   : > { %s1182_s12 = spop %1181 }
 0x2fe   : > { %v627_v20 = vstv %s1182_s12 }
 0x2ff   : > { %1258 = vrcp.f32 %v627_v20 }
 0x309   : > { %v1259_v31 = vpop.eup %1258 }
 0x30a   : > { %1183 = vpush %v1259_v31 }
 0x33b   : > { %s1184_s13 = spop %1183 }
 0x33c   : > { %v1675_v37 = vstv %s1184_s13 }
 0x33d   : > { %v679_v38 = vmul.f32 %v1675_v37, %v647_v22  ;;  %v680_v40 = vmul.f32 %v1675_v37, %v649_v32  ;;  %v681_v43 = vmul.f32 %v1675_v37, %v651_v33  ;;  %v682_v45 = vmul.f32 %v1675_v37, %v653_v25 }
 0x33e   : > { %v683_v47 = vmul.f32 %v1675_v37, %v655_v39  ;;  %v684_v50 = vmul.f32 %v1675_v37, %v657_v36  ;;  %v744_v53 = vmul.f32 %v714_v34, %v1675_v37  ;;  %v685_v55 = vmul.f32 %v1675_v37, %v659_v41 }
 0x33f   : > { %919 = vxpose.xlu1.b32.start [1/16] (narrow) %v679_v38, 8  ;;  %v760_v51 = vmul.f32 %v680_v40, %v680_v40  ;;  %v759_v54 = vmul.f32 %v679_v38, %v679_v38  ;;  %v743_v57 = vmul.f32 %v712_v23, %v1675_v37  ;;  %v761_v58 = vmul.f32 %v681_v43, %v681_v43 }
 0x340   : > { %v745_v60 = vmul.f32 %v716_v35, %v1675_v37  ;;  %v686_v62 = vmul.f32 %v1675_v37, %v661_v44  ;;  %v762_v0 = vmul.f32 %v682_v45, %v682_v45  ;;  %v746_v4 = vmul.f32 %v718_v42, %v1675_v37  ;;  %v673_v35 = vpop.xlane.xlu0 %672  ;;  %v732_v42 = vpop.xlane.xlu1 %731 }
 0x341   : > { %v776_v59 = vsub.f32 %v744_v53, %v760_v51  ;;  %v775_v61 = vsub.f32 %v743_v57, %v759_v54  ;;  %v687_v6 = vmul.f32 %v1675_v37, %v663_v48  ;;  %v763_v8 = vmul.f32 %v683_v47, %v683_v47 }
 0x342   : > { %v777_v1 = vsub.f32 %v745_v60, %v761_v58  ;;  %v778_v11 = vsub.f32 %v746_v4, %v762_v0  ;;  %v747_v9 = vmul.f32 %v720_v46, %v1675_v37  ;;  %v688_v15 = vmul.f32 %v1675_v37, %v665_v52 }
 0x343   : > { %920 = vxpose.xlu1.b32.cont [2/16] (narrow) %v680_v40, 8  ;;  %v1688_v2 = vmax.f32 %v776_v59, 0.0  ;;  %v791_v5 = vmax.f32 %v775_v61, 0.0  ;;  %v764_v18 = vmul.f32 %v684_v50, %v684_v50  ;;  %v748_v14 = vmul.f32 %v722_v49, %v1675_v37 }
 0x344   : > { %v1692_v7 = vmax.f32 %v777_v1, 0.0  ;;  %v779_v13 = vsub.f32 %v747_v9, %v763_v8  ;;  %v1697_v21 = vmax.f32 %v778_v11, 0.0  ;;  %v689_v24 = vmul.f32 %v1675_v37, %v667_v63  ;;  %v675_v53 = vpop.xlane.xlu0 %674  ;;  %v734_v60 = vpop.xlane.xlu1 %733 }
 0x345   : > { %1260 = vrsqrt.f32 %v1688_v2  ;;  %v765_v26 = vmul.f32 %v685_v55, %v685_v55  ;;  %v780_v27 = vsub.f32 %v748_v14, %v764_v18  ;;  %v749_v30 = vmul.f32 %v724_v56, %v1675_v37 }
 0x346   : > { %1262 = vrsqrt.f32 %v791_v5  ;;  %v1702_v17 = vmax.f32 %v779_v13, 0.0  ;;  %v1707_v19 = vmul.f32 %v1675_v37, %v669_v12  ;;  %v766_v20 = vmul.f32 %v686_v62, %v686_v62 }
 0x347   : > { %921 = vxpose.xlu1.b32.cont [3/16] (narrow) %v681_v43, 8  ;;  %1264 = vrsqrt.f32 %v1692_v7  ;;  %v781_v22 = vsub.f32 %v749_v30, %v765_v26  ;;  %v1709_v32 = vmax.f32 %v780_v27, 0.0  ;;  %v750_v23 = vmul.f32 %v726_v3, %v1675_v37 }
 0x348   : > { %1266 = vrsqrt.f32 %v1697_v21  ;;  %v1716_v36 = vmul.f32 %v1675_v37, %v671_v16  ;;  %vm809_vm4 = vcmp.eq.f32.partialorder %v791_v5, inf  ;;  %v812_v38 = vand.u32 2147483648, %v791_v5  ;;  %v677_v8 = vpop.xlane.xlu0 %676 }
 0x349   : > { %1268 = vrsqrt.f32 %v1702_v17  ;;  %v767_v39 = vmul.f32 %v687_v6, %v687_v6  ;;  %v782_v40 = vsub.f32 %v750_v23, %v766_v20  ;;  %vm811_vm5 = vcmp.eq.f32.partialorder %v791_v5, 0.0 }
 0x34a   : > { %v1718_v43 = vmax.f32 %v781_v22, 0.0  ;;  %1270 = vrsqrt.f32 %v1709_v32  ;;  %vm816_vm6 = vcmp.eq.f32.partialorder %v1688_v2, inf  ;;  %v819_v49 = vand.u32 2147483648, %v1688_v2 }
 0x34b   : > { %922 = vxpose.xlu1.b32.cont [4/16] (narrow) %v682_v45, 8  ;;  %v751_v45 = vmul.f32 %v728_v10, %v1675_v37  ;;  %v768_v51 = vmul.f32 %v688_v15, %v688_v15  ;;  %vm818_vm7 = vcmp.eq.f32.partialorder %v1688_v2, 0.0  ;;  %v1729_v54 = vmax.f32 %v782_v40, 0.0 }
 0x34c   : > { %1272 = vrsqrt.f32 %v1718_v43  ;;  %vm823_vm8 = vcmp.eq.f32.partialorder %v1692_v7, inf  ;;  %v752_v56 = vmul.f32 %v730_v29, %v1675_v37  ;;  %v826_v61 = vand.u32 2147483648, %v1692_v7 }
 0x34d   : > { %v783_v52 = vsub.f32 %v751_v45, %v767_v39  ;;  %v769_v63 = vmul.f32 %v689_v24, %v689_v24  ;;  %vm825_vm9 = vcmp.eq.f32.partialorder %v1692_v7, 0.0  ;;  %1274 = vrsqrt.f32 %v1729_v54 }
 0x34e   : > { %v784_v0 = vsub.f32 %v752_v56, %v768_v51  ;;  %vm830_vm10 = vcmp.eq.f32.partialorder %v1697_v21, inf  ;;  %v753_v3 = vmul.f32 %v732_v42, %v1675_v37  ;;  %v833_v11 = vand.u32 2147483648, %v1697_v21 }
 0x34f   : > { %923 = vxpose.xlu1.b32.cont [5/16] (narrow) %v683_v47, 8  ;;  %v1261_v28 = vpop.eup %1260  ;;  %v1739_v1 = vmax.f32 %v783_v52, 0.0  ;;  %v770_v12 = vmul.f32 %v1707_v19, %v1707_v19  ;;  %vm832_vm11 = vcmp.eq.f32.partialorder %v1697_v21, 0.0  ;;  %vm837_vm12 = vcmp.eq.f32.partialorder %v1702_v17, inf  ;;  %v742_v52 = vpop.xlane.xlu0 %741 }
 0x350   : > { %v1263_v31 = vpop.eup %1262  ;;  %v815_v34 = vmul.f32 %v1261_v28, %v1688_v2  ;;  %v785_v9 = vsub.f32 %v753_v3, %v769_v63  ;;  %v1751_v10 = vmax.f32 %v784_v0, 0.0  ;;  %v754_v13 = vmul.f32 %v734_v60, %v1675_v37 }
 0x351   : > { %v808_v33 = vmul.f32 %v1263_v31, %v791_v5  ;;  %v1265_v25 = vpop.eup %1264  ;;  %1276 = vrsqrt.f32 %v1739_v1  ;;  %v840_v26 = vand.u32 2147483648, %v1702_v17  ;;  %vm839_vm13 = vcmp.eq.f32.partialorder %v1702_v17, 0.0 }
 0x352   : > { %v817_v46 = vsel %vm816_vm6, %v1688_v2, %v815_v34  ;;  %v822_v47 = vmul.f32 %v1265_v25, %v1692_v7  ;;  %v1267_v48 = vpop.eup %1266  ;;  %v786_v27 = vsub.f32 %v754_v13, %v770_v12  ;;  %v1762_v28 = vmax.f32 %v785_v9, 0.0 }
 0x353   : > { %924 = vxpose.xlu1.b32.cont [6/16] (narrow) %v684_v50, 8  ;;  %v810_v41 = vsel %vm809_vm4, %v791_v5, %v808_v33  ;;  %v692_v50 = vmul.f32 %v1675_v37, %v673_v35  ;;  %v829_v58 = vmul.f32 %v1267_v48, %v1697_v21  ;;  %v1269_v59 = vpop.eup %1268  ;;  %1278 = vrsqrt.f32 %v1751_v10 }
 0x354   : > { %v813_v44 = vsel %vm811_vm5, %v812_v38, %v810_v41  ;;  %v824_v57 = vsel %vm823_vm8, %v1692_v7, %v822_v47  ;;  %v836_v5 = vmul.f32 %v1269_v59, %v1702_v17  ;;  %v694_v7 = vmul.f32 %v1675_v37, %v677_v8 }
 0x355   : > { %951 = vxpose.xlu0.b32.start [1/16] (narrow) %v813_v44, 8  ;;  %v827_v2 = vsel %vm825_vm9, %v826_v61, %v824_v57  ;;  %v831_v4 = vsel %vm830_vm10, %v1697_v21, %v829_v58  ;;  %v771_v21 = vmul.f32 %v1716_v36, %v1716_v36  ;;  %vm844_vm14 = vcmp.eq.f32.partialorder %v1709_v32, inf }
 0x356   : > { %v834_v18 = vsel %vm832_vm11, %v833_v11, %v831_v4  ;;  %v838_v14 = vsel %vm837_vm12, %v1702_v17, %v836_v5  ;;  %v847_v23 = vand.u32 2147483648, %v1709_v32  ;;  %v772_v33 = vmul.f32 %v692_v50, %v692_v50 }
 0x357   : > { %925 = vxpose.xlu1.b32.cont [7/16] (narrow) %v685_v55, 8  ;;  %v820_v55 = vsel %vm818_vm7, %v819_v49, %v817_v46  ;;  %v841_v29 = vsel %vm839_vm13, %v840_v26, %v838_v14  ;;  %vm846_vm15 = vcmp.eq.f32.partialorder %v1709_v32, 0.0  ;;  %v1771_v34 = vmax.f32 %v786_v27, 0.0 }
 0x358   : > { %1280 = vrsqrt.f32 %v1762_v28  ;;  %vm851_vm0 = vcmp.eq.f32.partialorder %v1718_v43, inf  ;;  %v854_v40 = vand.u32 2147483648, %v1718_v43  ;;  %vm853_vm1 = vcmp.eq.f32.partialorder %v1718_v43, 0.0 }
 0x359   : > { %952 = vxpose.xlu0.b32.cont [2/16] (narrow) %v820_v55, 8  ;;  %1282 = vrsqrt.f32 %v1771_v34  ;;  %vm858_vm2 = vcmp.eq.f32.partialorder %v1729_v54, inf  ;;  %v774_v51 = vmul.f32 %v694_v7, %v694_v7  ;;  %vm860_vm4 = vcmp.eq.f32.partialorder %v1729_v54, 0.0 }
 0x35a   : > { %vm865_vm5 = vcmp.eq.f32.partialorder %v1739_v1, inf  ;;  %v758_v56 = vmul.f32 %v742_v52, %v1675_v37  ;;  %v868_v60 = vand.u32 2147483648, %v1739_v1  ;;  %vm867_vm6 = vcmp.eq.f32.partialorder %v1739_v1, 0.0 }
 0x35b   : > { %926 = vxpose.xlu1.b32.cont [8/16] (narrow) %v686_v62, 8  ;;  %v693_v62 = vmul.f32 %v1675_v37, %v675_v53  ;;  %vm872_vm7 = vcmp.eq.f32.partialorder %v1751_v10, inf  ;;  %vm874_vm8 = vcmp.eq.f32.partialorder %v1751_v10, 0.0  ;;  %vm879_vm9 = vcmp.eq.f32.partialorder %v1762_v28, inf }
 0x35c   : > { %v790_v61 = vsub.f32 %v758_v56, %v774_v51  ;;  %v882_v8 = vand.u32 2147483648, %v1762_v28  ;;  %vm881_vm10 = vcmp.eq.f32.partialorder %v1762_v28, 0.0  ;;  %vm886_vm11 = vcmp.eq.f32.partialorder %v1771_v34, inf }
 0x35d   : > { %953 = vxpose.xlu0.b32.cont [3/16] (narrow) %v827_v2, 8  ;;  %v773_v41 = vmul.f32 %v693_v62, %v693_v62  ;;  %v875_v2 = vand.u32 2147483648, %v1751_v10  ;;  %vm888_vm12 = vcmp.eq.f32.partialorder %v1771_v34, 0.0 }
 0x35e   : > { %v806_v3 = vmax.f32 %v790_v61, 0.0 }
 0x35f   : > { %927 = vxpose.xlu1.b32.cont [9/16] (narrow) %v687_v6, 8  ;;  %v1271_v6 = vpop.eup %1270 }
 0x360   : > { %v1273_v16 = vpop.eup %1272 }
 0x361   : > { %954 = vxpose.xlu0.b32.cont [4/16] (narrow) %v834_v18, 8  ;;  %v850_v20 = vmul.f32 %v1273_v16, %v1718_v43  ;;  %v1275_v31 = vpop.eup %1274 }
 0x362   : > { %v857_v38 = vmul.f32 %v1275_v31, %v1729_v54  ;;  %v1277_v39 = vpop.eup %1276 }
 0x363   : > { %928 = vxpose.xlu1.b32.cont [10/16] (narrow) %v688_v15, 8  ;;  %v736_v15 = vpop.xlane.xlu1 %735  ;;  %v864_v48 = vmul.f32 %v1277_v39, %v1739_v1  ;;  %v1279_v49 = vpop.eup %1278 }
 0x364   : > { %v755_v30 = vmul.f32 %v736_v15, %v1675_v37  ;;  %v859_v47 = vsel %vm858_vm2, %v1729_v54, %v857_v38  ;;  %v871_v58 = vmul.f32 %v1279_v49, %v1751_v10  ;;  %v1281_v59 = vpop.eup %1280  ;;  %v889_v15 = vand.u32 2147483648, %v1771_v34 }
 0x365   : > { %955 = vxpose.xlu0.b32.cont [5/16] (narrow) %v841_v29, 8  ;;  %v866_v57 = vsel %vm865_vm5, %v1739_v1, %v864_v48  ;;  %v1283_v0 = vpop.eup %1282  ;;  %vm916_vm5 = vcmp.eq.f32.partialorder %v806_v3, 0.0 }
 0x366   : > { %v787_v17 = vsub.f32 %v755_v30, %v771_v21  ;;  %v873_v63 = vsel %vm872_vm7, %v1751_v10, %v871_v58  ;;  %v885_v5 = vmul.f32 %v1283_v0, %v1771_v34 }
 0x367   : > { %929 = vxpose.xlu1.b32.cont [11/16] (narrow) %v689_v24, 8  ;;  %v843_v24 = vmul.f32 %v1271_v6, %v1709_v32  ;;  %v738_v22 = vpop.xlane.xlu1 %737  ;;  %v876_v4 = vsel %vm874_vm8, %v875_v2, %v873_v63 }
 0x368   : > { %v756_v35 = vmul.f32 %v738_v22, %v1675_v37  ;;  %v1780_v44 = vmax.f32 %v787_v17, 0.0 }
 0x36a   : > { %v788_v42 = vsub.f32 %v756_v35, %v772_v33  ;;  %1284 = vrsqrt.f32 %v1780_v44  ;;  %vm893_vm13 = vcmp.eq.f32.partialorder %v1780_v44, inf }
 0x36b   : > { %930 = vxpose.xlu1.b32.cont [12/16] (narrow) %v1707_v19, 8  ;;  %v845_v19 = vsel %vm844_vm14, %v1709_v32, %v843_v24  ;;  %v740_v32 = vpop.xlane.xlu1 %739  ;;  %v896_v24 = vand.u32 2147483648, %v1780_v44  ;;  %vm895_vm14 = vcmp.eq.f32.partialorder %v1780_v44, 0.0 }
 0x36c   : > { %v848_v25 = vsel %vm846_vm15, %v847_v23, %v845_v19  ;;  %v757_v46 = vmul.f32 %v740_v32, %v1675_v37  ;;  %v804_v53 = vmax.f32 %v788_v42, 0.0  ;;  %v878_v37 = vmul.f32 %v1281_v59, %v1762_v28 }
 0x36d   : > { %956 = vxpose.xlu0.b32.cont [6/16] (narrow) %v848_v25, 8  ;;  %v917_v23 = vand.u32 2147483648, %v806_v3 }
 0x36e   : > { %1286 = vrsqrt.f32 %v804_v53  ;;  %v880_v1 = vsel %vm879_vm9, %v1762_v28, %v878_v37  ;;  %vm900_vm15 = vcmp.eq.f32.partialorder %v804_v53, inf  ;;  %v903_v28 = vand.u32 2147483648, %v804_v53 }
 0x36f   : > { %931 = vxpose.xlu1.b32.cont [13/16] (narrow) %v1716_v36, 8  ;;  %v852_v36 = vsel %vm851_vm0, %v1718_v43, %v850_v20  ;;  %v789_v43 = vsub.f32 %v757_v46, %v773_v41  ;;  %v883_v11 = vsel %vm881_vm10, %v882_v8, %v880_v1  ;;  %vm902_vm0 = vcmp.eq.f32.partialorder %v804_v53, 0.0 }
 0x370   : > { %v855_v45 = vsel %vm853_vm1, %v854_v40, %v852_v36 }
 0x371   : > { %957 = vxpose.xlu0.b32.cont [7/16] (narrow) %v855_v45, 8 }
 0x373   : > { %932 = vxpose.xlu1.b32.cont [14/16] (narrow) %v692_v50, 8  ;;  %v861_v50 = vand.u32 2147483648, %v1729_v54  ;;  %v805_v54 = vmax.f32 %v789_v43, 0.0 }
 0x374   : > { %v1285_v6 = vpop.eup %1284 }
 0x375   : > { %v862_v55 = vsel %vm860_vm4, %v861_v50, %v859_v47  ;;  %1288 = vrsqrt.f32 %v805_v54  ;;  %v892_v12 = vmul.f32 %v1285_v6, %v1780_v44  ;;  %vm907_vm1 = vcmp.eq.f32.partialorder %v805_v54, inf }
 0x376   : > { %958 = vxpose.xlu0.b32.cont [8/16] (narrow) %v862_v55, 8  ;;  %1290 = vrsqrt.f32 %v806_v3  ;;  %v910_v20 = vand.u32 2147483648, %v805_v54  ;;  %vm909_vm2 = vcmp.eq.f32.partialorder %v805_v54, 0.0  ;;  %vm914_vm4 = vcmp.eq.f32.partialorder %v806_v3, inf }
 0x377   : > { %933 = vxpose.xlu1.b32.cont [15/16] (narrow) %v693_v62, 8  ;;  %v869_v62 = vsel %vm867_vm6, %v868_v60, %v866_v57  ;;  %v894_v18 = vsel %vm893_vm13, %v1780_v44, %v892_v12 }
 0x378   : > { %v1287_v9 = vpop.eup %1286  ;;  %v897_v16 = vsel %vm895_vm14, %v896_v24, %v894_v18 }
 0x379   : > { %v899_v13 = vmul.f32 %v1287_v9, %v804_v53 }
 0x37a   : > { %959 = vxpose.xlu0.b32.cont [9/16] (narrow) %v869_v62, 8 }
 0x37b   : > { %934 = vxpose.xlu1.b32.end [16/16] (narrow) %v694_v7, 8  ;;  %v887_v7 = vsel %vm886_vm11, %v1771_v34, %v885_v5  ;;  %v901_v26 = vsel %vm900_vm15, %v804_v53, %v899_v13 }
 0x37c   : > { %v890_v10 = vsel %vm888_vm12, %v889_v15, %v887_v7  ;;  %v904_v29 = vsel %vm902_vm0, %v903_v28, %v901_v26 }
 0x37e   : > { %960 = vxpose.xlu0.b32.cont [10/16] (narrow) %v876_v4, 8 }
 0x37f   : > { %v1289_v14 = vpop.eup %1288 }
 0x380   : > { %v906_v21 = vmul.f32 %v1289_v14, %v805_v54  ;;  %v1291_v27 = vpop.eup %1290 }
 0x381   : > { %v913_v19 = vmul.f32 %v1291_v27, %v806_v3 }
 0x382   : > { %961 = vxpose.xlu0.b32.cont [11/16] (narrow) %v883_v11, 8  ;;  %v908_v30 = vsel %vm907_vm1, %v805_v54, %v906_v21 }
 0x383   : > { %v911_v31 = vsel %vm909_vm2, %v910_v20, %v908_v30  ;;  %v915_v22 = vsel %vm914_vm4, %v806_v3, %v913_v19 }
 0x384   : > { %v918_v33 = vsel %vm916_vm5, %v917_v23, %v915_v22 }
 0x386   : > { %962 = vxpose.xlu0.b32.cont [12/16] (narrow) %v890_v10, 8 }
 0x38a   : > { %963 = vxpose.xlu0.b32.cont [13/16] (narrow) %v897_v16, 8 }
 0x38e   : > { %964 = vxpose.xlu0.b32.cont [14/16] (narrow) %v904_v29, 8 }
 0x392   : > { %965 = vxpose.xlu0.b32.cont [15/16] (narrow) %v911_v31, 8 }
 0x396   : > { %966 = vxpose.xlu0.b32.end [16/16] (narrow) %v918_v33, 8 }
 0x3bf   : > { %v935_v34 = vpop.trf.xlu1 }
 0x3da   : > { %v967_v17 = vpop.trf.xlu0 }
 0x3db   : > { %v984_v25 = vrot.slane %v967_v17, 7 }
 0x3dd   : > { %v986_v35 = vsel %vm616_vm3, %v935_v34, %v984_v25 }
 0x3de   : > { %987 = vst [vmem:[%s258_s4] sm:$0x3] %v986_v35 }
 0x3df   : > { %1335 = shalt.err (!%p1332_p5)
}
 0x3e0   : > { %s1336_s26 = scalar_lea.hbm %s1820_s6, 32  ;;  %s1340_s12 = scalar_lea.hbm %s1875_s5, 64 }
 0x3e1   : > { %p1337_p4 = scmp.ne.s32.totalorder %s1820_s6, %s1336_s26  ;;  %p1341_p12 = scmp.lt.u32.totalorder %s1820_s6, %s1875_s5 }
 0x3e2   : > { %p1342_p1 = scmp.lt.u32.totalorder %s1340_s12, %s1336_s26  ;;  %p1344_p8 = scmp.lt.u32.totalorder %s1336_s26, %s1820_s6 }
 0x3e3   : > { %p1338_p7 = pnand %p1337_p4, %p1883_p9 }
 0x3e4   : > { %p1343_p3 = por %p1342_p1, %p1341_p12 }
 0x3e5   : > { %p1339_p10 = pneg %p1338_p7 }
 0x3e6   : > { %p1345_p11 = por %p1344_p8, %p1343_p3 }
 0x3e8   : > { %p1346_p0 = pnand %p1345_p11, %p1339_p10 }
 0x3ea   : > { %1349 = shalt.err (!%p1346_p0)
}
 0x3eb   : > { %1187 = dma.vmem_to_hbm [thread:$0]  (%p1883_p9), %s1822_s28, 32, %s1820_s6, %s989_s15  }
 0x3ec PF: > { %s1014_s16 = sand.u32 1, %s1384_s20   ;;  %p1884_p6 = scmp.ne.s32.totalorder %s1880_s9, 0 }
 0x3ed   : > { %p1885_p13 = scmp.ge.s32.totalorder %s1404_s25, 2  ;;  %s1015_s4 = scalar_lea.sflag [#allocation8], %s1014_s16 }
 0x3ef   : > { %p1194_p2 = pnand %p1885_p13, %p1884_p6 }
 0x3f1   : > { %1379 = dma.done.wait (!%p1194_p2), %s1015_s4, 32  }
 0x3f2   : > { %1381 = vsyncadd (!%p1194_p2), %s1015_s4, 4294967264  ;;  %s22_s25 = sadd.s32 1, %s1404_s25   ;;  %s1886_s20 = smov %s1388_s21 }
 0x3f3   : > { %p19_p5 = scmp.ge.s32.totalorder %s22_s25, 4   ;;  %s1887_s21 = smov %s1392_s22 }
 0x3f4   : > { %s1888_s22 = smov %s1503_s8  ;;  %s1889_s23 = smov %s1400_s24 }
 0x3f5   : > { %s1890_s24 = smov %s1892_s27  ;;  %21 = sbr.rel (!%p19_p5) target bundleno = 8 (0x8), region = 93 }
 0x3fc   :  { %1020 = vsyncpa [#allocation7], 1 }
 0x3fd   :  { %1022 = vsyncpa [#allocation7 + $0x1], 1 }
 0x3fe   :  { %1023 = vsyncpa [#allocation8], 1 }
 0x3ff   :  { %1025 = vsyncpa [#allocation8 + $0x1], 1 }

</bundles_post_ra>
